<compile_context>
chip_gen: v5e
topology: v5e:2x2
jax: 0.10.0
libtpu: 0.0.40
codegen_flags: <defaults>
</compile_context>

<pallas_src>
import jax
import jax.numpy as jnp
from jax.experimental import pallas as pl
from jax.experimental.pallas import tpu as pltpu

LANE = 128  # f32 lane width


# ----------------------------------------------------------------------------
# parameters
# ----------------------------------------------------------------------------
def make_params(key, raw_size=200, feat_size=60, hidden_size=22, pred_hidden=30):
    """Deterministic synthetic parameters. Weights stored as [in, out], biases [1, out]."""
    dims_raw = [raw_size, hidden_size, hidden_size, hidden_size, hidden_size, feat_size]
    dims_pred = [feat_size, pred_hidden, 1]
    params = []
    for dims in (dims_raw, dims_pred):
        for d_in, d_out in zip(dims[:-1], dims[1:]):
            key, kw, kb = jax.random.split(key, 3)
            scale = 1.0 / jnp.sqrt(jnp.float32(d_in))
            w = jax.random.uniform(kw, (d_in, d_out), jnp.float32, -scale, scale)
            b = jax.random.uniform(kb, (1, d_out), jnp.float32, -scale, scale)
            params.append(w)
            params.append(b)
    return params  # [w1,b1,...,w5,b5, wp1,bp1, wp2,bp2]


def _round8(x):
    return (x + 7) // 8 * 8


def pack_params(params):
    """Fuse w5@wp1 and pack everything into one lane-padded f32 slab [rows, 128].

    Weights that multiply a 128-lane activation are zero-padded to full
    [128, 128] tiles (rows AND lanes), so the kernel reads whole tiles and
    never emits masked lane slices.  w1 keeps K = raw rows (feats last dim is
    not padded in HBM).  Biases occupy one row each, 8-row-aligned starts.

    Returns (slab, layout); layout[i] = (row_start, read_rows) in kernel order
    [w1, b1, w2, b2, w3, b3, w4, b4, Wf, bf, wp2, bp2].
    """
    (w1, b1, w2, b2, w3, b3, w4, b4, w5, b5, wp1, bp1, wp2, bp2) = params

    # Pack-time fusion (one-off): no ReLU between w5 and wp1, so fold them.
    # Done at HIGHEST precision so only fp reassociation differs vs. reference.
    hi = jax.lax.Precision.HIGHEST
    wf = jnp.dot(w5, wp1, precision=hi)            # [22, 30]
    bf = jnp.dot(b5, wp1, precision=hi) + bp1      # [1, 30]

    entries = [
        (w1, w1.shape[0]),   # read K = raw rows
        (b1, 1),
        (w2, LANE), (b2, 1),
        (w3, LANE), (b3, 1),
        (w4, LANE), (b4, 1),
        (wf, LANE), (bf, 1),
        (wp2, LANE), (bp2, 1),
    ]

    layout, row = [], 0
    for arr, read_rows in entries:
        layout.append((row, read_rows))
        row += _round8(max(arr.shape[0], read_rows))
    total_rows = _round8(row)

    slab = jnp.zeros((total_rows, LANE), jnp.float32)
    for (arr, _), (r0, _) in zip(entries, layout):
        slab = slab.at[r0:r0 + arr.shape[0], :arr.shape[1]].set(arr.astype(jnp.float32))
    return slab, tuple(layout)


# ----------------------------------------------------------------------------
# kernel
# ----------------------------------------------------------------------------
def _make_kernel(layout, tile_b, n):
    """Kernel closure over the static packed-parameter layout and tile sizes."""
    inv_n = 1.0 / float(n)

    def kernel(feats_ref, p_ref, out_ref):
        f32 = jnp.float32

        def rd(entry):                       # static full-lane slice of the packed slab
            r0, nr = entry
            return p_ref[r0:r0 + nr, :]      # [nr, 128] -- no masked lane slice

        (w1, b1, w2, b2, w3, b3, w4, b4,
         wf, bf, wp2, bp2) = [rd(e) for e in layout]

        # mlp_raw_to_feat hidden layers on all TILE_B*N rows; activations stay
        # a full 128 lanes wide (padded lanes are exact zeros throughout).
        h = feats_ref[...]                                                     # [T*N, raw]
        h = jnp.maximum(jnp.dot(h, w1, preferred_element_type=f32) + b1, 0.0)  # [T*N, 128]
        h = jnp.maximum(jnp.dot(h, w2, preferred_element_type=f32) + b2, 0.0)
        h = jnp.maximum(jnp.dot(h, w3, preferred_element_type=f32) + b3, 0.0)
        h = jnp.maximum(jnp.dot(h, w4, preferred_element_type=f32) + b4, 0.0)

        # Per-bag mean BEFORE the (fused) last linear layer:
        # mean(h4) @ Wf + bf == mean(h4 @ w5 + b5) @ wp1 + bp1.
        # Bags are contiguous runs of N rows; N == f32 sublane count and the
        # lane dim is exactly 128, so each bag is one (8,128) vreg tile and
        # the reduce is a copy-free XLU sublane reduction.
        pooled = jnp.sum(h.reshape(tile_b, n, h.shape[-1]), axis=1) * inv_n    # [T, 128]

        # fused head: relu(pooled @ (w5@wp1) + (b5@wp1+bp1)) @ wp2 + bp2
        p = jnp.maximum(jnp.dot(pooled, wf, preferred_element_type=f32) + bf, 0.0)  # [T, 128]
        res = jnp.dot(p, wp2, preferred_element_type=f32) + bp2                     # [T, 128]
        out_ref[...] = res[:, 0:1]           # only the real output column             [T, 1]

    return kernel


# ----------------------------------------------------------------------------
# wrapper
# ----------------------------------------------------------------------------
def build_forward(layout, slab_rows, *, B, N, TILE_B, raw, feat_size, hidden_size,
                  pred_hidden):
    """Build a jitted forward: (feats [B,N,raw], slab) -> scores [B,1].

    For large B pick TILE_B so rows = TILE_B*N is ~512-2048 (MXU M fill +
    amortized ~0.35us/step), keep num_tiles >= 4 (>=2 per TensorCore on v7x),
    and keep 2*rows*raw*4B + slab under the per-generation VMEM limits
    (v7x: 32 MiB scoped default / 64 MiB physical).
    """
    assert B % TILE_B == 0, "whole bags per tile"
    assert (TILE_B * N) % 8 == 0 or TILE_B * N == B * N, "feats block sublane alignment"
    assert TILE_B % 8 == 0 or TILE_B == B, "output block sublane alignment"

    num_tiles = B // TILE_B
    rows = TILE_B * N
    kernel = _make_kernel(layout, TILE_B, N)

    flops = (2 * B * N * (raw * hidden_size + 3 * hidden_size * hidden_size)   # hidden MLP
             + B * N * hidden_size                                             # pooling adds
             + 2 * B * (hidden_size * pred_hidden + pred_hidden))              # fused head
    bytes_accessed = 4 * (B * N * raw + slab_rows * LANE + B)
    cost = pl.CostEstimate(flops=flops, transcendentals=0,
                           bytes_accessed=bytes_accessed)

    call = pl.pallas_call(
        kernel,
        out_shape=jax.ShapeDtypeStruct((B, 1), jnp.float32),
        grid=(num_tiles,),
        in_specs=[
            # feats: tiled over bags -> pipelined (double-buffered) HBM->VMEM DMA.
            # Last dim stays raw=200 (no K padding of the big HBM stream).
            pl.BlockSpec((rows, raw), lambda i: (i, 0)),
            # packed parameter slab: constant block index -> fetched once, resident.
            # (single-buffering it is only worth VMEM headroom when num_tiles > 1)
            pl.BlockSpec((slab_rows, LANE), lambda i: (0, 0)),
        ],
        out_specs=pl.BlockSpec((TILE_B, 1), lambda i: (i, 0)),
        compiler_params=pltpu.CompilerParams(
            dimension_semantics=("parallel",)),   # bag-tile axis -> megacore on v7x
        cost_estimate=cost,
    )

    @jax.jit
    def forward(feats, slab):
        feats_flat = feats.reshape(B * N, raw)
        return call(feats_flat, slab)

    return forward


# ----------------------------------------------------------------------------
# pure-JAX reference mirroring the PyTorch forward (unfused weights)
# ----------------------------------------------------------------------------
def reference_forward(feats, params):
    (w1, b1, w2, b2, w3, b3, w4, b4, w5, b5, wp1, bp1, wp2, bp2) = params
    outs = []
    for b in range(feats.shape[0]):
        h = feats[b]
        h = jnp.maximum(h @ w1 + b1, 0.0)
        h = jnp.maximum(h @ w2 + b2, 0.0)
        h = jnp.maximum(h @ w3 + b3, 0.0)
        h = jnp.maximum(h @ w4 + b4, 0.0)
        h = h @ w5 + b5
        outs.append(jnp.mean(h, axis=0, keepdims=True))
    out = jnp.concatenate(outs, axis=0)
    p = jnp.maximum(out @ wp1 + bp1, 0.0)
    return p @ wp2 + bp2


if __name__ == "__main__":
    B, N = 16, 8                          # 16 "bags", 8 feature rows each
    RAW, FEAT, HID, PRED_HID = 200, 60, 22, 30   # module defaults
    TILE_B = B                            # demo sizes -> single grid step (grid=(1,))

    key = jax.random.PRNGKey(0)
    k_feats, k_rewards, k_params = jax.random.split(key, 3)

    feats = jax.random.normal(k_feats, (B, N, RAW), dtype=jnp.float32)
    rewards = jax.random.normal(k_rewards, (B,), dtype=jnp.float32)  # dead code in torch forward
    params = make_params(k_params, RAW, FEAT, HID, PRED_HID)

    slab, layout = pack_params(params)
    forward = build_forward(layout, slab.shape[0], B=B, N=N, TILE_B=TILE_B,
                            raw=RAW, feat_size=FEAT, hidden_size=HID,
                            pred_hidden=PRED_HID)

    out = jax.block_until_ready(forward(feats, slab))

    ref = reference_forward(feats, params)
    assert out.shape == (B, 1)
    assert jnp.allclose(out, ref, atol=1e-4, rtol=1e-4), (out, ref)

    print("KERNEL_OK")
</pallas_src>

<mosaic_0001>
module attributes {stable_mosaic.version = 11 : i64} {
  func.func @kernel(%arg0: i32, %arg1: memref<128x200xf32, #tpu.memory_space<vmem>>, %arg2: memref<888x128xf32, #tpu.memory_space<vmem>>, %arg3: memref<16x1xf32, #tpu.memory_space<vmem>>) attributes {dimension_semantics = [#tpu.dimension_semantics<parallel>], iteration_bounds = array<i64: 1>, scalar_prefetch = 0 : i64, scratch_operands = 0 : i64, tpu.core_type = #tpu.core_type<tc>, window_params = [{transform_indices = @transform_0, window_bounds = array<i64: 128, 200>}, {pipeline_mode = #tpu.pipeline_mode<synchronous>, transform_indices = @transform_1, window_bounds = array<i64: 888, 128>}, {transform_indices = @transform_2, window_bounds = array<i64: 16, 1>}]} {
    %c0 = arith.constant 0 : index
    %c0_0 = arith.constant 0 : index
    %0 = vector.load %arg2[%c0, %c0_0] : memref<888x128xf32, #tpu.memory_space<vmem>>, vector<200x128xf32>
    %c200 = arith.constant 200 : index
    %c0_1 = arith.constant 0 : index
    %1 = vector.load %arg2[%c200, %c0_1] : memref<888x128xf32, #tpu.memory_space<vmem>>, vector<1x128xf32>
    %c208 = arith.constant 208 : index
    %c0_2 = arith.constant 0 : index
    %2 = vector.load %arg2[%c208, %c0_2] : memref<888x128xf32, #tpu.memory_space<vmem>>, vector<128x128xf32>
    %c336 = arith.constant 336 : index
    %c0_3 = arith.constant 0 : index
    %3 = vector.load %arg2[%c336, %c0_3] : memref<888x128xf32, #tpu.memory_space<vmem>>, vector<1x128xf32>
    %c344 = arith.constant 344 : index
    %c0_4 = arith.constant 0 : index
    %4 = vector.load %arg2[%c344, %c0_4] : memref<888x128xf32, #tpu.memory_space<vmem>>, vector<128x128xf32>
    %c472 = arith.constant 472 : index
    %c0_5 = arith.constant 0 : index
    %5 = vector.load %arg2[%c472, %c0_5] : memref<888x128xf32, #tpu.memory_space<vmem>>, vector<1x128xf32>
    %c480 = arith.constant 480 : index
    %c0_6 = arith.constant 0 : index
    %6 = vector.load %arg2[%c480, %c0_6] : memref<888x128xf32, #tpu.memory_space<vmem>>, vector<128x128xf32>
    %c608 = arith.constant 608 : index
    %c0_7 = arith.constant 0 : index
    %7 = vector.load %arg2[%c608, %c0_7] : memref<888x128xf32, #tpu.memory_space<vmem>>, vector<1x128xf32>
    %c616 = arith.constant 616 : index
    %c0_8 = arith.constant 0 : index
    %8 = vector.load %arg2[%c616, %c0_8] : memref<888x128xf32, #tpu.memory_space<vmem>>, vector<128x128xf32>
    %c744 = arith.constant 744 : index
    %c0_9 = arith.constant 0 : index
    %9 = vector.load %arg2[%c744, %c0_9] : memref<888x128xf32, #tpu.memory_space<vmem>>, vector<1x128xf32>
    %c752 = arith.constant 752 : index
    %c0_10 = arith.constant 0 : index
    %10 = vector.load %arg2[%c752, %c0_10] : memref<888x128xf32, #tpu.memory_space<vmem>>, vector<128x128xf32>
    %c880 = arith.constant 880 : index
    %c0_11 = arith.constant 0 : index
    %11 = vector.load %arg2[%c880, %c0_11] : memref<888x128xf32, #tpu.memory_space<vmem>>, vector<1x128xf32>
    %c0_12 = arith.constant 0 : index
    %c0_13 = arith.constant 0 : index
    %12 = vector.load %arg1[%c0_12, %c0_13] : memref<128x200xf32, #tpu.memory_space<vmem>>, vector<128x200xf32>
    %cst = arith.constant dense<0.000000e+00> : vector<128x128xf32>
    %13 = tpu.matmul %12, %0, %cst {dimension_numbers = #tpu.dot_dimension_numbers<[1], [0], [0], [1], [0, 0, 1, 1], [], []>} : vector<128x200xf32>, vector<200x128xf32>, vector<128x128xf32> -> vector<128x128xf32>
    %14 = vector.broadcast %1 : vector<1x128xf32> to vector<128x128xf32>
    %15 = arith.addf %13, %14 : vector<128x128xf32>
    %cst_14 = arith.constant 0.000000e+00 : f32
    %16 = vector.broadcast %cst_14 : f32 to vector<128x128xf32>
    %17 = arith.maximumf %15, %16 : vector<128x128xf32>
    %cst_15 = arith.constant dense<0.000000e+00> : vector<128x128xf32>
    %18 = tpu.matmul %17, %2, %cst_15 {dimension_numbers = #tpu.dot_dimension_numbers<[1], [0], [0], [1], [0, 0, 1, 1], [], []>} : vector<128x128xf32>, vector<128x128xf32>, vector<128x128xf32> -> vector<128x128xf32>
    %19 = vector.broadcast %3 : vector<1x128xf32> to vector<128x128xf32>
    %20 = arith.addf %18, %19 : vector<128x128xf32>
    %cst_16 = arith.constant 0.000000e+00 : f32
    %21 = vector.broadcast %cst_16 : f32 to vector<128x128xf32>
    %22 = arith.maximumf %20, %21 : vector<128x128xf32>
    %cst_17 = arith.constant dense<0.000000e+00> : vector<128x128xf32>
    %23 = tpu.matmul %22, %4, %cst_17 {dimension_numbers = #tpu.dot_dimension_numbers<[1], [0], [0], [1], [0, 0, 1, 1], [], []>} : vector<128x128xf32>, vector<128x128xf32>, vector<128x128xf32> -> vector<128x128xf32>
    %24 = vector.broadcast %5 : vector<1x128xf32> to vector<128x128xf32>
    %25 = arith.addf %23, %24 : vector<128x128xf32>
    %cst_18 = arith.constant 0.000000e+00 : f32
    %26 = vector.broadcast %cst_18 : f32 to vector<128x128xf32>
    %27 = arith.maximumf %25, %26 : vector<128x128xf32>
    %cst_19 = arith.constant dense<0.000000e+00> : vector<128x128xf32>
    %28 = tpu.matmul %27, %6, %cst_19 {dimension_numbers = #tpu.dot_dimension_numbers<[1], [0], [0], [1], [0, 0, 1, 1], [], []>} : vector<128x128xf32>, vector<128x128xf32>, vector<128x128xf32> -> vector<128x128xf32>
    %29 = vector.broadcast %7 : vector<1x128xf32> to vector<128x128xf32>
    %30 = arith.addf %28, %29 : vector<128x128xf32>
    %cst_20 = arith.constant 0.000000e+00 : f32
    %31 = vector.broadcast %cst_20 : f32 to vector<128x128xf32>
    %32 = arith.maximumf %30, %31 : vector<128x128xf32>
    %33 = vector.shape_cast %32 : vector<128x128xf32> to vector<16x8x128xf32>
    %cst_21 = arith.constant dense<0.000000e+00> : vector<16x128xf32>
    %34 = vector.multi_reduction <add>, %33, %cst_21 [1] : vector<16x8x128xf32> to vector<16x128xf32>
    %cst_22 = arith.constant 1.250000e-01 : f32
    %35 = vector.broadcast %cst_22 : f32 to vector<16x128xf32>
    %36 = arith.mulf %34, %35 : vector<16x128xf32>
    %cst_23 = arith.constant dense<0.000000e+00> : vector<16x128xf32>
    %37 = tpu.matmul %36, %8, %cst_23 {dimension_numbers = #tpu.dot_dimension_numbers<[1], [0], [0], [1], [0, 0, 1, 1], [], []>} : vector<16x128xf32>, vector<128x128xf32>, vector<16x128xf32> -> vector<16x128xf32>
    %38 = vector.broadcast %9 : vector<1x128xf32> to vector<16x128xf32>
    %39 = arith.addf %37, %38 : vector<16x128xf32>
    %cst_24 = arith.constant 0.000000e+00 : f32
    %40 = vector.broadcast %cst_24 : f32 to vector<16x128xf32>
    %41 = arith.maximumf %39, %40 : vector<16x128xf32>
    %cst_25 = arith.constant dense<0.000000e+00> : vector<16x128xf32>
    %42 = tpu.matmul %41, %10, %cst_25 {dimension_numbers = #tpu.dot_dimension_numbers<[1], [0], [0], [1], [0, 0, 1, 1], [], []>} : vector<16x128xf32>, vector<128x128xf32>, vector<16x128xf32> -> vector<16x128xf32>
    %43 = vector.broadcast %11 : vector<1x128xf32> to vector<16x128xf32>
    %44 = arith.addf %42, %43 : vector<16x128xf32>
    %45 = vector.extract_strided_slice %44 {offsets = [0, 0], sizes = [16, 1], strides = [1, 1]} : vector<16x128xf32> to vector<16x1xf32>
    %c0_26 = arith.constant 0 : index
    %c0_27 = arith.constant 0 : index
    %46 = vector.load %arg3[%c0_26, %c0_27] : memref<16x1xf32, #tpu.memory_space<vmem>>, vector<16x1xf32>
    tpu.vector_store %arg3[%c0_26, %c0_27], %45 {strides = array<i32>} : memref<16x1xf32, #tpu.memory_space<vmem>>, vector<16x1xf32>,
    return
  }
  func.func @transform_0(%arg0: i32) -> (i32, i32) {
    %c0_i32 = arith.constant 0 : i32
    %c0_i32_0 = arith.constant 0 : i32
    return %arg0, %c0_i32 : i32, i32
  }
  func.func @transform_1(%arg0: i32) -> (i32, i32) {
    %c0_i32 = arith.constant 0 : i32
    %c0_i32_0 = arith.constant 0 : i32
    %c0_i32_1 = arith.constant 0 : i32
    return %c0_i32, %c0_i32_0 : i32, i32
  }
  func.func @transform_2(%arg0: i32) -> (i32, i32) {
    %c0_i32 = arith.constant 0 : i32
    %c0_i32_0 = arith.constant 0 : i32
    return %arg0, %c0_i32 : i32, i32
  }
}

</mosaic_0001>

<bundles_post_ra>
// kernel: forward.1
= control target key start
LH: loop header
LB: loop body
LE: loop exit
PB: predicated region body
PF: predicated region fallthrough
CT: control target
= control target key end

     0   :  { %7 = vsyncpa [#allocation3], 0  ;;  %s1071_s0 = inlined_call_operand.hbm [shape: f32[128,200], index: 0, kind: input, shape index: {}]   ;;  %s1072_s1 = inlined_call_operand.hbm [shape: f32[888,128], index: 1, kind: input, shape index: {}]   ;;  %s1073_s2 = inlined_call_operand.vmem [shape: f32[16,1], index: 2, kind: output, shape index: {}]  }
   0x1   :  { %s13_s11 = sshll.u32 %s1071_s0, 4  ;;  %s14_s11 = int_to_ptr.hbm [resolvable:$true] %s13_s11 }
   0x2   :  { %8 = vsyncpa [#allocation5], 0  ;;  %s936_s12 = smov [#allocation2]   ;;  %s26_s16 = sshll.u32 %s1072_s1, 4  ;;  %s27_s16 = int_to_ptr.hbm [resolvable:$true] %s26_s16 }
   0x3   :  { %s15_s13 = sshll.u32 %s936_s12, 4  ;;  %s937_s17 = smov 256   ;;  %s16_s13 = int_to_ptr.vmem [resolvable:$true] %s15_s13 }
   0x4   :  { %s938_s18 = smov 16   ;;  %s939_s19 = smov [#allocation4]  }
   0x5   :  { %21 = dma.hbm_to_vmem [thread:$0]  %s14_s11, 4096, %s16_s13, [#allocation3], %s937_s17, %s937_s17, %s938_s18  }
   0x6   :  { %s28_s20 = sshll.u32 %s939_s19, 4  ;;  %s940_s21 = smov 128   ;;  %s29_s20 = int_to_ptr.vmem [resolvable:$true] %s28_s20 }
   0x7   :  { %s941_s22 = smov 8  }
   0x8   :  { %34 = dma.hbm_to_vmem [thread:$0]  %s27_s16, 14208, %s29_s20, [#allocation5], %s940_s21, %s940_s21, %s941_s22  }
   0x9   :  { %932 = dma.done.wait [#allocation3], 4096  }
   0xa   :  { %933 = vsyncadd [#allocation3], 4294963200 }
   0xb   :  { %934 = dma.done.wait [#allocation5], 14208  }
   0xc   :  { %935 = vsyncadd [#allocation5], 4294953088  ;;  %v58_v0 = vld [vmem:[#allocation4 + $0x78] sm:$0xff]  ;;  %v57_v1 = vld [vmem:[#allocation4 + $0x70] sm:$0xff]  ;;  %vm187_vm0 = vcmask 588800   ;;  %vm757_vm1 = vcmask 1041409  }
   0xd   :  { %236 = vmatpush.msra.mxu0 %v58_v0  ;;  %v56_v2 = vld [vmem:[#allocation4 + $0x68] sm:$0xff]  ;;  %v67_v3 = vld [vmem:[#allocation4 + $0xc0] sm:$0xff]  ;;  %v66_v4 = vld [vmem:[#allocation4 + $0xb8] sm:$0xff]  ;;  %vm759_vm2 = vcmask 1042434   ;;  %vm761_vm3 = vcmask 1043459   ;;  %vm763_vm4 = vcmask 1044484  }
   0xe   :  { %v55_v5 = vld [vmem:[#allocation4 + $0x60] sm:$0xff]  ;;  %308 = vmatpush.msra.mxu1 %v67_v3  ;;  %854 = vmatpush.msra.mxu2 %v67_v3  ;;  %v65_v6 = vld [vmem:[#allocation4 + $0xb0] sm:$0xff]  ;;  %v54_v7 = vld [vmem:[#allocation4 + $0x58] sm:$0xff]  ;;  %vm765_vm5 = vcmask 1045509   ;;  %vm767_vm6 = vcmask 1046534   ;;  %vm769_vm7 = vcmask 1047559  }
   0xf   :  { %237 = vmatpush.msra.mxu0 %v57_v1  ;;  %855 = vmatpush.msra.mxu3 %v67_v3  ;;  %v64_v8 = vld [vmem:[#allocation4 + $0xa8] sm:$0xff]  ;;  %v53_v9 = vld [vmem:[#allocation4 + $0x50] sm:$0xff]  ;;  %v63_v11 = vld [vmem:[#allocation4 + $0xa0] sm:$0xff]  ;;  %vm829_vm8 = vcmask 7168  }
  0x10   :  { %309 = vmatpush.msra.mxu1 %v66_v4  ;;  %856 = vmatpush.msra.mxu2 %v66_v4  ;;  %v52_v10 = vld [vmem:[#allocation4 + $0x48] sm:$0xff]  ;;  %v62_v12 = vld [vmem:[#allocation4 + $0x98] sm:$0xff]  ;;  %v51_v13 = vld [vmem:[#allocation4 + $0x40] sm:$0xff] }
  0x11   :  { %238 = vmatpush.msra.mxu0 %v56_v2  ;;  %857 = vmatpush.msra.mxu3 %v66_v4  ;;  %v61_v14 = vld [vmem:[#allocation4 + $0x90] sm:$0xff]  ;;  %v50_v15 = vld [vmem:[#allocation4 + $0x38] sm:$0xff]  ;;  %v60_v16 = vld [vmem:[#allocation4 + $0x88] sm:$0xff] }
  0x12   :  { %310 = vmatpush.msra.mxu1 %v65_v6  ;;  %858 = vmatpush.msra.mxu2 %v65_v6  ;;  %v49_v17 = vld [vmem:[#allocation4 + $0x30] sm:$0xff]  ;;  %v59_v18 = vld [vmem:[#allocation4 + $0x80] sm:$0xff]  ;;  %v48_v19 = vld [vmem:[#allocation4 + $0x28] sm:$0xff] }
  0x13   :  { %239 = vmatpush.msra.mxu0 %v55_v5  ;;  %859 = vmatpush.msra.mxu3 %v65_v6  ;;  %v155_v20 = vld [vmem:[#allocation2 + $0x8] sm:$0xff]  ;;  %v47_v21 = vld [vmem:[#allocation4 + $0x20] sm:$0xff]  ;;  %v46_v22 = vld [vmem:[#allocation4 + $0x18] sm:$0xff] }
  0x14   :  { %311 = vmatpush.msra.mxu1 %v64_v8  ;;  %860 = vmatpush.msra.mxu2 %v64_v8  ;;  %v45_v23 = vld [vmem:[#allocation4 + $0x10] sm:$0xff]  ;;  %v44_v24 = vld [vmem:[#allocation4 + $0x8] sm:$0xff]  ;;  %v157_v25 = vld [vmem:[#allocation2 + $0x18] sm:$0xff] }
  0x15   :  { %240 = vmatpush.msra.mxu0 %v54_v7  ;;  %861 = vmatpush.msra.mxu3 %v64_v8  ;;  %v43_v26 = vld [vmem:[#allocation4] sm:$0xff]  ;;  %v159_v28 = vld [vmem:[#allocation2 + $0x28] sm:$0xff]  ;;  %v156_v29 = vld [vmem:[#allocation2 + $0x10] sm:$0xff] }
  0x16   :  { %312 = vmatpush.msra.mxu1 %v63_v11  ;;  %862 = vmatpush.msra.mxu2 %v63_v11  ;;  %v154_v27 = vld [vmem:[#allocation2] sm:$0xff]  ;;  %v167_v30 = vld [vmem:[#allocation2 + $0x68] sm:$0xff]  ;;  %v161_v31 = vld [vmem:[#allocation2 + $0x38] sm:$0xff] }
  0x17   :  { %241 = vmatpush.msra.mxu0 %v53_v9  ;;  %863 = vmatpush.msra.mxu3 %v63_v11  ;;  %v158_v32 = vld [vmem:[#allocation2 + $0x20] sm:$0xff]  ;;  %v169_v33 = vld [vmem:[#allocation2 + $0x78] sm:$0xff]  ;;  %v163_v34 = vld [vmem:[#allocation2 + $0x48] sm:$0xff] }
  0x18   :  { %313 = vmatpush.msra.mxu1 %v62_v12  ;;  %864 = vmatpush.msra.mxu2 %v62_v12  ;;  %v160_v35 = vld [vmem:[#allocation2 + $0x30] sm:$0xff]  ;;  %v171_v36 = vld [vmem:[#allocation2 + $0x88] sm:$0xff]  ;;  %v165_v37 = vld [vmem:[#allocation2 + $0x58] sm:$0xff] }
  0x19   :  { %242 = vmatpush.msra.mxu0 %v52_v10  ;;  %865 = vmatpush.msra.mxu3 %v62_v12  ;;  %v162_v38 = vld [vmem:[#allocation2 + $0x40] sm:$0xff]  ;;  %v173_v39 = vld [vmem:[#allocation2 + $0x98] sm:$0xff]  ;;  %v164_v40 = vld [vmem:[#allocation2 + $0x50] sm:$0xff] }
  0x1a   :  { %314 = vmatpush.msra.mxu1 %v61_v14  ;;  %866 = vmatpush.msra.mxu2 %v61_v14  ;;  %v175_v41 = vld [vmem:[#allocation2 + $0xa8] sm:$0xff]  ;;  %v166_v42 = vld [vmem:[#allocation2 + $0x60] sm:$0xff]  ;;  %v177_v43 = vld [vmem:[#allocation2 + $0xb8] sm:$0xff] }
  0x1b   :  { %243 = vmatpush.msra.mxu0 %v51_v13  ;;  %867 = vmatpush.msra.mxu3 %v61_v14  ;;  %v168_v44 = vld [vmem:[#allocation2 + $0x70] sm:$0xff]  ;;  %v179_v45 = vld [vmem:[#allocation2 + $0xc8] sm:$0xff]  ;;  %v170_v46 = vld [vmem:[#allocation2 + $0x80] sm:$0xff] }
  0x1c   :  { %315 = vmatpush.msra.mxu1 %v60_v16  ;;  %868 = vmatpush.msra.mxu2 %v60_v16  ;;  %v181_v47 = vld [vmem:[#allocation2 + $0xd8] sm:$0xff]  ;;  %v84_v48 = vld [vmem:[#allocation4 + $0x148] sm:$0xff]  ;;  %v83_v49 = vld [vmem:[#allocation4 + $0x140] sm:$0xff] }
  0x1d   :  { %244 = vmatpush.msra.mxu0 %v50_v15  ;;  %869 = vmatpush.msra.mxu3 %v60_v16  ;;  %v172_v50 = vld [vmem:[#allocation2 + $0x90] sm:$0xff]  ;;  %v82_v51 = vld [vmem:[#allocation4 + $0x138] sm:$0xff]  ;;  %v183_v53 = vld [vmem:[#allocation2 + $0xe8] sm:$0xff] }
  0x1e   :  { %316 = vmatpush.msra.mxu1 %v59_v18  ;;  %870 = vmatpush.msra.mxu2 %v59_v18  ;;  %v81_v52 = vld [vmem:[#allocation4 + $0x130] sm:$0xff]  ;;  %v80_v54 = vld [vmem:[#allocation4 + $0x128] sm:$0xff]  ;;  %v79_v55 = vld [vmem:[#allocation4 + $0x120] sm:$0xff] }
  0x1f   :  { %245 = vmatpush.msra.mxu0 %v49_v17  ;;  %838 = vmatmul.msk.f32.vlgmr.msra.gmra.mxu1 %vm187_vm0, %v155_v20  ;;  %v174_v56 = vld [vmem:[#allocation2 + $0xa0] sm:$0xff]  ;;  %v78_v57 = vld [vmem:[#allocation4 + $0x118] sm:$0xff]  ;;  %v77_v58 = vld [vmem:[#allocation4 + $0x110] sm:$0xff] }
  0x20   :  { %871 = vmatpush.msra.mxu3 %v59_v18  ;;  %844 = vmatmul.msk.f32.vlgmr.msra.gmra.mxu2 %vm187_vm0, %v167_v30  ;;  %v185_v59 = vld [vmem:[#allocation2 + $0xf8] sm:$0xff]  ;;  %v76_v60 = vld [vmem:[#allocation4 + $0x108] sm:$0xff]  ;;  %v75_v61 = vld [vmem:[#allocation4 + $0x100] sm:$0xff] }
  0x21   :  { %246 = vmatpush.msra.mxu0 %v48_v19  ;;  %848 = vmatmul.msk.f32.vlgmr.msra.gmra.mxu3 %vm187_vm0, %v175_v41  ;;  %v176_v62 = vld [vmem:[#allocation2 + $0xb0] sm:$0xff]  ;;  %v74_v63 = vld [vmem:[#allocation4 + $0xf8] sm:$0xff]  ;;  %v72_v1 = vld [vmem:[#allocation4 + $0xe8] sm:$0xff] }
  0x22   :  { %383 = vmatpush.msrb.mxu2 %v84_v48  ;;  %v73_v0 = vld [vmem:[#allocation4 + $0xf0] sm:$0xff]  ;;  %v178_v2 = vld [vmem:[#allocation2 + $0xc0] sm:$0xff]  ;;  %v70_v4 = vld [vmem:[#allocation4 + $0xd8] sm:$0xff] }
  0x23   :  { %247 = vmatpush.msra.mxu0 %v47_v21  ;;  %v71_v3 = vld [vmem:[#allocation4 + $0xe0] sm:$0xff]  ;;  %v69_v5 = vld [vmem:[#allocation4 + $0xd0] sm:$0xff]  ;;  %v979_v10 = vld [vmem:[#allocation4 + $0xc8] ss:$0 sm:$0xff] }
  0x24   :  { %384 = vmatpush.msrb.mxu2 %v83_v49  ;;  %v180_v6 = vld [vmem:[#allocation2 + $0xd0] sm:$0xff]  ;;  %v182_v7 = vld [vmem:[#allocation2 + $0xe0] sm:$0xff] }
  0x25   :  { %248 = vmatpush.msra.mxu0 %v46_v22  ;;  %v184_v9 = vld [vmem:[#allocation2 + $0xf0] sm:$0xff] }
  0x26   :  { %385 = vmatpush.msrb.mxu2 %v82_v51  ;;  %v101_v51 = vld [vmem:[#allocation4 + $0x1d0] sm:$0xff] }
  0x27   :  { %249 = vmatpush.msra.mxu0 %v45_v23  ;;  %839 = vmatmul.msk.f32.gmra.mxu1 %vm187_vm0, %v157_v25 }
  0x28   :  { %845 = vmatmul.msk.f32.gmra.mxu2 %vm187_vm0, %v169_v33  ;;  %465 = vmatpush.msrb.mxu3 %v101_v51 }
  0x29   :  { %250 = vmatpush.msra.mxu0 %v44_v24  ;;  %849 = vmatmul.msk.f32.gmra.mxu3 %vm187_vm0, %v177_v43 }
  0x2a   :  { %386 = vmatpush.msrb.mxu2 %v81_v52 }
  0x2b   :  { %251 = vmatpush.msra.mxu0 %v43_v26 }
  0x2c   :  { %252 = vmatmul.f32.vlgmr.msra.gmra.mxu0 %v154_v27  ;;  %387 = vmatpush.msrb.mxu2 %v80_v54 }
  0x2e   :  { %388 = vmatpush.msrb.mxu2 %v79_v55 }
  0x2f   :  { %840 = vmatmul.msk.f32.gmra.mxu1 %vm187_vm0, %v159_v28 }
  0x30   :  { %846 = vmatmul.msk.f32.gmra.mxu2 %vm187_vm0, %v171_v36 }
  0x31   :  { %850 = vmatmul.msk.f32.gmra.mxu3 %vm187_vm0, %v179_v45  ;;  %389 = vmatpush.msrb.mxu2 %v78_v57  ;;  %v99_v57 = vld [vmem:[#allocation4 + $0x1c0] sm:$0xff] }
  0x33   :  { %390 = vmatpush.msrb.mxu2 %v77_v58 }
  0x34   :  { %255 = vmatmul.f32.gmra.mxu0 %v156_v29 }
  0x35   :  { %391 = vmatpush.msrb.mxu2 %v76_v60 }
  0x37   :  { %841 = vmatmul.msk.f32.gmra.mxu1 %vm187_vm0, %v161_v31  ;;  %392 = vmatpush.msrb.mxu2 %v75_v61 }
  0x38   :  { %847 = vmatmul.msk.f32.gmra.mxu2 %vm187_vm0, %v173_v39 }
  0x39   :  { %851 = vmatmul.msk.f32.gmra.mxu3 %vm187_vm0, %v181_v47  ;;  %393 = vmatpush.msrb.mxu2 %v74_v63 }
  0x3b   :  { %394 = vmatpush.msrb.mxu2 %v73_v0 }
  0x3c   :  { %258 = vmatmul.f32.gmra.mxu0 %v158_v32 }
  0x3d   :  { %395 = vmatpush.msrb.mxu2 %v72_v1  ;;  %v97_v1 = vld [vmem:[#allocation4 + $0x1b0] sm:$0xff] }
  0x3f   :  { %842 = vmatmul.msk.f32.gmra.mxu1 %vm187_vm0, %v163_v34  ;;  %396 = vmatpush.msrb.mxu2 %v71_v3 }
  0x41   :  { %852 = vmatmul.msk.f32.gmra.mxu3 %vm187_vm0, %v183_v53  ;;  %397 = vmatpush.msrb.mxu2 %v70_v4 }
  0x43   :  { %398 = vmatpush.msrb.mxu2 %v69_v5 }
  0x44   :  { %261 = vmatmul.f32.gmra.mxu0 %v160_v35 }
  0x47   :  { %843 = vmatmul.msk.f32.gmra.mxu1 %vm187_vm0, %v165_v37 }
  0x49   :  { %853 = vmatmul.msk.f32.gmra.mxu3 %vm187_vm0, %v185_v59 }
  0x4c   :  { %264 = vmatmul.f32.gmra.mxu0 %v162_v38 }
  0x54   :  { %267 = vmatmul.f32.gmra.mxu0 %v164_v40 }
  0x5c   :  { %270 = vmatmul.f32.gmra.mxu0 %v166_v42 }
  0x64   :  { %273 = vmatmul.f32.gmra.mxu0 %v168_v44 }
  0x6c   :  { %276 = vmatmul.f32.gmra.mxu0 %v170_v46 }
  0x74   :  { %279 = vmatmul.f32.gmra.mxu0 %v172_v50 }
  0x7c   :  { %282 = vmatmul.f32.gmra.mxu0 %v174_v56  ;;  %v100_v56 = vld [vmem:[#allocation4 + $0x1c8] sm:$0xff] }
  0x7d   :  { %466 = vmatpush.msrb.mxu3 %v100_v56 }
  0x7f   :  { %467 = vmatpush.msrb.mxu3 %v99_v57 }
  0x84   :  { %285 = vmatmul.f32.gmra.mxu0 %v176_v62  ;;  %v98_v62 = vld [vmem:[#allocation4 + $0x1b8] sm:$0xff] }
  0x85   :  { %468 = vmatpush.msrb.mxu3 %v98_v62 }
  0x87   :  { %469 = vmatpush.msrb.mxu3 %v97_v1 }
  0x8c   :  { %288 = vmatmul.f32.gmra.mxu0 %v178_v2  ;;  %v96_v2 = vld [vmem:[#allocation4 + $0x1a8] sm:$0xff] }
  0x8d   :  { %470 = vmatpush.msrb.mxu3 %v96_v2 }
  0x94   :  { %291 = vmatmul.f32.gmra.mxu0 %v180_v6  ;;  %v95_v6 = vld [vmem:[#allocation4 + $0x1a0] sm:$0xff] }
  0x95   :  { %471 = vmatpush.msrb.mxu3 %v95_v6 }
  0x9c   :  { %294 = vmatmul.f32.gmra.mxu0 %v182_v7  ;;  %v318_v8 = vpop.f32.mrf.mxu1 }
  0xa3   :  { %v336_v38 = vpop.f32.mrf.mxu2 }
  0xa4   :  { %297 = vmatmul.f32.gmra.mxu0 %v184_v9  ;;  %v321_v12 = vpop.f32.mrf.mxu1  ;;  %v348_v58 = vpop.f32.mrf.mxu3  ;;  %v94_v9 = vld [vmem:[#allocation4 + $0x198] sm:$0xff] }
  0xa5   :  { %472 = vmatpush.msrb.mxu3 %v94_v9  ;;  %v115_v9 = vld [vmem:[#allocation4 + $0x240] sm:$0xff] }
  0xa9   :  { %v253_v11 = vpop.f32.mrf.mxu0 }
  0xaa   :  { %v254_v13 = vadd.f32 %v979_v10, %v253_v11  ;;  %v93_v11 = vld [vmem:[#allocation4 + $0x190] sm:$0xff] }
  0xab   :  { %v339_v44 = vpop.f32.mrf.mxu2  ;;  %473 = vmatpush.msrb.mxu3 %v93_v11 }
  0xac   :  { %v319_v14 = vadd.f32 %v318_v8, %v254_v13  ;;  %v324_v18 = vpop.f32.mrf.mxu1  ;;  %v351_v4 = vpop.f32.mrf.mxu3 }
  0xae   :  { %v366_v15 = vmax.f32 %v319_v14, 0.0 }
  0xb0   :  { %399 = vmatmul.f32.vlgmr.msrb.gmra.mxu2 %v366_v15 }
  0xb1   :  { %v256_v16 = vpop.f32.mrf.mxu0 }
  0xb2   :  { %v257_v17 = vadd.f32 %v979_v10, %v256_v16 }
  0xb3   :  { %v342_v50 = vpop.f32.mrf.mxu2 }
  0xb4   :  { %v322_v19 = vadd.f32 %v321_v12, %v257_v17  ;;  %v327_v24 = vpop.f32.mrf.mxu1  ;;  %v354_v14 = vpop.f32.mrf.mxu3  ;;  %v92_v17 = vld [vmem:[#allocation4 + $0x188] sm:$0xff] }
  0xb5   :  { %474 = vmatpush.msrb.mxu3 %v92_v17 }
  0xb6   :  { %v367_v20 = vmax.f32 %v322_v19, 0.0  ;;  %v90_v19 = vld [vmem:[#allocation4 + $0x178] sm:$0xff] }
  0xb8   :  { %402 = vmatmul.f32.gmra.mxu2 %v367_v20 }
  0xb9   :  { %v259_v21 = vpop.f32.mrf.mxu0 }
  0xba   :  { %v260_v22 = vadd.f32 %v979_v10, %v259_v21 }
  0xbb   :  { %v345_v60 = vpop.f32.mrf.mxu2 }
  0xbc   :  { %v325_v23 = vadd.f32 %v324_v18, %v260_v22  ;;  %v330_v30 = vpop.f32.mrf.mxu1  ;;  %v91_v18 = vld [vmem:[#allocation4 + $0x180] sm:$0xff]  ;;  %v89_v22 = vld [vmem:[#allocation4 + $0x170] sm:$0xff] }
  0xbd   :  { %475 = vmatpush.msrb.mxu3 %v91_v18 }
  0xbe   :  { %v368_v25 = vmax.f32 %v325_v23, 0.0 }
  0xbf   :  { %476 = vmatpush.msrb.mxu3 %v90_v19 }
  0xc0   :  { %405 = vmatmul.f32.gmra.mxu2 %v368_v25  ;;  %v357_v25 = vpop.f32.mrf.mxu3 }
  0xc1   :  { %v262_v26 = vpop.f32.mrf.mxu0  ;;  %477 = vmatpush.msrb.mxu3 %v89_v22 }
  0xc2   :  { %v263_v27 = vadd.f32 %v979_v10, %v262_v26 }
  0xc4   :  { %v328_v28 = vadd.f32 %v327_v24, %v263_v27  ;;  %v333_v36 = vpop.f32.mrf.mxu1  ;;  %v88_v24 = vld [vmem:[#allocation4 + $0x168] sm:$0xff]  ;;  %v87_v27 = vld [vmem:[#allocation4 + $0x160] sm:$0xff] }
  0xc5   :  { %478 = vmatpush.msrb.mxu3 %v88_v24 }
  0xc6   :  { %v369_v29 = vmax.f32 %v328_v28, 0.0 }
  0xc7   :  { %479 = vmatpush.msrb.mxu3 %v87_v27  ;;  %v107_v27 = vld [vmem:[#allocation4 + $0x200] sm:$0xff] }
  0xc8   :  { %408 = vmatmul.f32.gmra.mxu2 %v369_v29 }
  0xc9   :  { %v265_v31 = vpop.f32.mrf.mxu0 }
  0xca   :  { %v266_v32 = vadd.f32 %v979_v10, %v265_v31 }
  0xcc   :  { %v331_v33 = vadd.f32 %v330_v30, %v266_v32  ;;  %v86_v32 = vld [vmem:[#allocation4 + $0x158] sm:$0xff] }
  0xcd   :  { %480 = vmatpush.msrb.mxu3 %v86_v32 }
  0xce   :  { %v370_v34 = vmax.f32 %v331_v33, 0.0  ;;  %v360_v33 = vpop.f32.mrf.mxu3 }
  0xd0   :  { %411 = vmatmul.f32.gmra.mxu2 %v370_v34 }
  0xd1   :  { %v268_v35 = vpop.f32.mrf.mxu0 }
  0xd2   :  { %v269_v37 = vadd.f32 %v979_v10, %v268_v35 }
  0xd4   :  { %v334_v39 = vadd.f32 %v333_v36, %v269_v37 }
  0xd6   :  { %v371_v40 = vmax.f32 %v334_v39, 0.0  ;;  %v363_v39 = vpop.f32.mrf.mxu3 }
  0xd8   :  { %414 = vmatmul.f32.gmra.mxu2 %v371_v40 }
  0xd9   :  { %v271_v41 = vpop.f32.mrf.mxu0 }
  0xda   :  { %v272_v42 = vadd.f32 %v979_v10, %v271_v41 }
  0xdc   :  { %v337_v43 = vadd.f32 %v336_v38, %v272_v42 }
  0xde   :  { %v372_v45 = vmax.f32 %v337_v43, 0.0  ;;  %v997_v43 = vld [vmem:[#allocation4 + $0x150] ss:$0 sm:$0xff] }
  0xe0   :  { %417 = vmatmul.f32.gmra.mxu2 %v372_v45 }
  0xe1   :  { %v274_v46 = vpop.f32.mrf.mxu0 }
  0xe2   :  { %v275_v47 = vadd.f32 %v979_v10, %v274_v46 }
  0xe4   :  { %v340_v48 = vadd.f32 %v339_v44, %v275_v47 }
  0xe6   :  { %v373_v49 = vmax.f32 %v340_v48, 0.0 }
  0xe8   :  { %420 = vmatmul.f32.gmra.mxu2 %v373_v49 }
  0xe9   :  { %v277_v52 = vpop.f32.mrf.mxu0 }
  0xea   :  { %v278_v53 = vadd.f32 %v979_v10, %v277_v52 }
  0xec   :  { %v343_v54 = vadd.f32 %v342_v50, %v278_v53 }
  0xee   :  { %v374_v55 = vmax.f32 %v343_v54, 0.0 }
  0xf0   :  { %423 = vmatmul.f32.gmra.mxu2 %v374_v55 }
  0xf1   :  { %v280_v59 = vpop.f32.mrf.mxu0 }
  0xf2   :  { %v281_v61 = vadd.f32 %v979_v10, %v280_v59 }
  0xf4   :  { %v346_v63 = vadd.f32 %v345_v60, %v281_v61 }
  0xf6   :  { %v375_v0 = vmax.f32 %v346_v63, 0.0 }
  0xf8   :  { %426 = vmatmul.f32.gmra.mxu2 %v375_v0 }
  0xf9   :  { %v283_v3 = vpop.f32.mrf.mxu0 }
  0xfa   :  { %v284_v5 = vadd.f32 %v979_v10, %v283_v3  ;;  %v118_v3 = vld [vmem:[#allocation4 + $0x258] sm:$0xff] }
  0xfb   :  { %547 = vmatpush.msrb.mxu1 %v118_v3 }
  0xfc   :  { %v349_v7 = vadd.f32 %v348_v58, %v284_v5 }
  0xfe   :  { %v376_v8 = vmax.f32 %v349_v7, 0.0  ;;  %v117_v7 = vld [vmem:[#allocation4 + $0x250] sm:$0xff] }
  0xff   :  { %548 = vmatpush.msrb.mxu1 %v117_v7 }
 0x100   :  { %429 = vmatmul.f32.gmra.mxu2 %v376_v8  ;;  %v116_v8 = vld [vmem:[#allocation4 + $0x248] sm:$0xff] }
 0x101   :  { %v286_v12 = vpop.f32.mrf.mxu0  ;;  %549 = vmatpush.msrb.mxu1 %v116_v8 }
 0x102   :  { %v287_v13 = vadd.f32 %v979_v10, %v286_v12 }
 0x103   :  { %550 = vmatpush.msrb.mxu1 %v115_v9 }
 0x104   :  { %v352_v15 = vadd.f32 %v351_v4, %v287_v13 }
 0x106   :  { %v377_v16 = vmax.f32 %v352_v15, 0.0  ;;  %v113_v15 = vld [vmem:[#allocation4 + $0x230] sm:$0xff] }
 0x108   :  { %432 = vmatmul.f32.gmra.mxu2 %v377_v16  ;;  %v112_v16 = vld [vmem:[#allocation4 + $0x228] sm:$0xff] }
 0x109   :  { %v289_v20 = vpop.f32.mrf.mxu0 }
 0x10a   :  { %v290_v21 = vadd.f32 %v979_v10, %v289_v20  ;;  %v111_v20 = vld [vmem:[#allocation4 + $0x220] sm:$0xff] }
 0x10c   :  { %v355_v23 = vadd.f32 %v354_v14, %v290_v21  ;;  %v114_v14 = vld [vmem:[#allocation4 + $0x238] sm:$0xff] }
 0x10d   :  { %551 = vmatpush.msrb.mxu1 %v114_v14  ;;  %v110_v21 = vld [vmem:[#allocation4 + $0x218] sm:$0xff] }
 0x10e   :  { %v378_v26 = vmax.f32 %v355_v23, 0.0 }
 0x10f   :  { %552 = vmatpush.msrb.mxu1 %v113_v15 }
 0x110   :  { %435 = vmatmul.f32.gmra.mxu2 %v378_v26  ;;  %v108_v26 = vld [vmem:[#allocation4 + $0x208] sm:$0xff] }
 0x111   :  { %v292_v28 = vpop.f32.mrf.mxu0  ;;  %553 = vmatpush.msrb.mxu1 %v112_v16 }
 0x112   :  { %v293_v29 = vadd.f32 %v979_v10, %v292_v28  ;;  %v106_v28 = vld [vmem:[#allocation4 + $0x1f8] sm:$0xff] }
 0x113   :  { %554 = vmatpush.msrb.mxu1 %v111_v20 }
 0x114   :  { %v358_v30 = vadd.f32 %v357_v25, %v293_v29  ;;  %v109_v25 = vld [vmem:[#allocation4 + $0x210] sm:$0xff] }
 0x115   :  { %555 = vmatpush.msrb.mxu1 %v110_v21 }
 0x116   :  { %v379_v31 = vmax.f32 %v358_v30, 0.0 }
 0x117   :  { %556 = vmatpush.msrb.mxu1 %v109_v25 }
 0x118   :  { %438 = vmatmul.f32.gmra.mxu2 %v379_v31  ;;  %v105_v31 = vld [vmem:[#allocation4 + $0x1f0] sm:$0xff] }
 0x119   :  { %v295_v34 = vpop.f32.mrf.mxu0  ;;  %557 = vmatpush.msrb.mxu1 %v108_v26  ;;  %v135_v26 = vld [vmem:[#allocation4 + $0x2e0] sm:$0xff] }
 0x11a   :  { %v296_v35 = vadd.f32 %v979_v10, %v295_v34  ;;  %780 = vmatpush.msrb.mxu0 %v135_v26 }
 0x11b   :  { %558 = vmatpush.msrb.mxu1 %v107_v27 }
 0x11c   :  { %v361_v36 = vadd.f32 %v360_v33, %v296_v35  ;;  %v104_v33 = vld [vmem:[#allocation4 + $0x1e8] sm:$0xff] }
 0x11d   :  { %559 = vmatpush.msrb.mxu1 %v106_v28 }
 0x11e   :  { %v380_v37 = vmax.f32 %v361_v36, 0.0 }
 0x11f   :  { %560 = vmatpush.msrb.mxu1 %v105_v31 }
 0x120   :  { %441 = vmatmul.f32.gmra.mxu2 %v380_v37  ;;  %v103_v37 = vld [vmem:[#allocation4 + $0x1e0] sm:$0xff] }
 0x121   :  { %v298_v38 = vpop.f32.mrf.mxu0  ;;  %561 = vmatpush.msrb.mxu1 %v104_v33 }
 0x122   :  { %v299_v40 = vadd.f32 %v979_v10, %v298_v38 }
 0x123   :  { %562 = vmatpush.msrb.mxu1 %v103_v37  ;;  %v130_v37 = vld [vmem:[#allocation4 + $0x2b8] sm:$0xff] }
 0x124   :  { %v364_v41 = vadd.f32 %v363_v39, %v299_v40 }
 0x126   :  { %v381_v42 = vmax.f32 %v364_v41, 0.0 }
 0x128   :  { %444 = vmatmul.f32.gmra.mxu2 %v381_v42 }
 0x133   :  { %v400_v44 = vpop.f32.mrf.mxu2 }
 0x134   :  { %v401_v45 = vadd.f32 %v997_v43, %v400_v44 }
 0x136   :  { %v448_v46 = vmax.f32 %v401_v45, 0.0  ;;  %v1015_v45 = vld [vmem:[#allocation4 + $0x1d8] ss:$0 sm:$0xff] }
 0x138   :  { %481 = vmatmul.f32.vlgmr.msrb.gmra.mxu3 %v448_v46 }
 0x13b   :  { %v403_v47 = vpop.f32.mrf.mxu2 }
 0x13c   :  { %v404_v48 = vadd.f32 %v997_v43, %v403_v47 }
 0x13e   :  { %v449_v49 = vmax.f32 %v404_v48, 0.0 }
 0x140   :  { %484 = vmatmul.f32.gmra.mxu3 %v449_v49 }
 0x143   :  { %v406_v50 = vpop.f32.mrf.mxu2 }
 0x144   :  { %v407_v51 = vadd.f32 %v997_v43, %v406_v50 }
 0x146   :  { %v450_v52 = vmax.f32 %v407_v51, 0.0 }
 0x148   :  { %487 = vmatmul.f32.gmra.mxu3 %v450_v52 }
 0x14b   :  { %v409_v10 = vpop.f32.mrf.mxu2 }
 0x14c   :  { %v410_v53 = vadd.f32 %v997_v43, %v409_v10 }
 0x14e   :  { %v451_v54 = vmax.f32 %v410_v53, 0.0 }
 0x150   :  { %490 = vmatmul.f32.gmra.mxu3 %v451_v54 }
 0x153   :  { %v412_v55 = vpop.f32.mrf.mxu2 }
 0x154   :  { %v413_v56 = vadd.f32 %v997_v43, %v412_v55 }
 0x156   :  { %v452_v57 = vmax.f32 %v413_v56, 0.0 }
 0x158   :  { %493 = vmatmul.f32.gmra.mxu3 %v452_v57 }
 0x15b   :  { %v415_v58 = vpop.f32.mrf.mxu2 }
 0x15c   :  { %v416_v59 = vadd.f32 %v997_v43, %v415_v58 }
 0x15e   :  { %v453_v60 = vmax.f32 %v416_v59, 0.0 }
 0x160   :  { %496 = vmatmul.f32.gmra.mxu3 %v453_v60 }
 0x163   :  { %v418_v61 = vpop.f32.mrf.mxu2 }
 0x164   :  { %v419_v62 = vadd.f32 %v997_v43, %v418_v61 }
 0x166   :  { %v454_v63 = vmax.f32 %v419_v62, 0.0 }
 0x168   :  { %499 = vmatmul.f32.gmra.mxu3 %v454_v63 }
 0x16b   :  { %v421_v0 = vpop.f32.mrf.mxu2 }
 0x16c   :  { %v422_v1 = vadd.f32 %v997_v43, %v421_v0 }
 0x16e   :  { %v455_v2 = vmax.f32 %v422_v1, 0.0 }
 0x170   :  { %502 = vmatmul.f32.gmra.mxu3 %v455_v2 }
 0x173   :  { %v424_v4 = vpop.f32.mrf.mxu2 }
 0x174   :  { %v425_v5 = vadd.f32 %v997_v43, %v424_v4 }
 0x176   :  { %v456_v6 = vmax.f32 %v425_v5, 0.0 }
 0x178   :  { %505 = vmatmul.f32.gmra.mxu3 %v456_v6 }
 0x17b   :  { %v427_v11 = vpop.f32.mrf.mxu2 }
 0x17c   :  { %v428_v12 = vadd.f32 %v997_v43, %v427_v11 }
 0x17e   :  { %v457_v13 = vmax.f32 %v428_v12, 0.0 }
 0x180   :  { %508 = vmatmul.f32.gmra.mxu3 %v457_v13 }
 0x183   :  { %v430_v17 = vpop.f32.mrf.mxu2 }
 0x184   :  { %v431_v18 = vadd.f32 %v997_v43, %v430_v17 }
 0x186   :  { %v458_v19 = vmax.f32 %v431_v18, 0.0 }
 0x188   :  { %511 = vmatmul.f32.gmra.mxu3 %v458_v19 }
 0x18b   :  { %v433_v22 = vpop.f32.mrf.mxu2 }
 0x18c   :  { %v434_v23 = vadd.f32 %v997_v43, %v433_v22 }
 0x18e   :  { %v459_v24 = vmax.f32 %v434_v23, 0.0 }
 0x190   :  { %514 = vmatmul.f32.gmra.mxu3 %v459_v24 }
 0x193   :  { %v436_v29 = vpop.f32.mrf.mxu2 }
 0x194   :  { %v437_v30 = vadd.f32 %v997_v43, %v436_v29 }
 0x196   :  { %v460_v32 = vmax.f32 %v437_v30, 0.0  ;;  %v134_v30 = vld [vmem:[#allocation4 + $0x2d8] sm:$0xff] }
 0x197   :  { %781 = vmatpush.msrb.mxu0 %v134_v30 }
 0x198   :  { %517 = vmatmul.f32.gmra.mxu3 %v460_v32  ;;  %v133_v32 = vld [vmem:[#allocation4 + $0x2d0] sm:$0xff] }
 0x199   :  { %782 = vmatpush.msrb.mxu0 %v133_v32 }
 0x19b   :  { %v439_v34 = vpop.f32.mrf.mxu2 }
 0x19c   :  { %v440_v35 = vadd.f32 %v997_v43, %v439_v34  ;;  %v132_v34 = vld [vmem:[#allocation4 + $0x2c8] sm:$0xff] }
 0x19d   :  { %783 = vmatpush.msrb.mxu0 %v132_v34 }
 0x19e   :  { %v461_v36 = vmax.f32 %v440_v35, 0.0 }
 0x1a0   :  { %520 = vmatmul.f32.gmra.mxu3 %v461_v36  ;;  %v131_v36 = vld [vmem:[#allocation4 + $0x2c0] sm:$0xff] }
 0x1a1   :  { %784 = vmatpush.msrb.mxu0 %v131_v36 }
 0x1a3   :  { %v442_v38 = vpop.f32.mrf.mxu2  ;;  %785 = vmatpush.msrb.mxu0 %v130_v37 }
 0x1a4   :  { %v443_v39 = vadd.f32 %v997_v43, %v442_v38 }
 0x1a6   :  { %v462_v40 = vmax.f32 %v443_v39, 0.0  ;;  %v129_v39 = vld [vmem:[#allocation4 + $0x2b0] sm:$0xff] }
 0x1a7   :  { %786 = vmatpush.msrb.mxu0 %v129_v39 }
 0x1a8   :  { %523 = vmatmul.f32.gmra.mxu3 %v462_v40  ;;  %v128_v40 = vld [vmem:[#allocation4 + $0x2a8] sm:$0xff] }
 0x1a9   :  { %787 = vmatpush.msrb.mxu0 %v128_v40 }
 0x1ab   :  { %v445_v41 = vpop.f32.mrf.mxu2 }
 0x1ac   :  { %v446_v42 = vadd.f32 %v997_v43, %v445_v41  ;;  %v127_v41 = vld [vmem:[#allocation4 + $0x2a0] sm:$0xff] }
 0x1ad   :  { %788 = vmatpush.msrb.mxu0 %v127_v41 }
 0x1ae   :  { %v463_v44 = vmax.f32 %v446_v42, 0.0  ;;  %v126_v42 = vld [vmem:[#allocation4 + $0x298] sm:$0xff] }
 0x1af   :  { %789 = vmatpush.msrb.mxu0 %v126_v42 }
 0x1b0   :  { %526 = vmatmul.f32.gmra.mxu3 %v463_v44  ;;  %v1033_v44 = vld [vmem:[#allocation4 + $0x260] ss:$0 sm:$0xff] }
 0x1bb   :  { %v482_v46 = vpop.f32.mrf.mxu3 }
 0x1bc   :  { %v483_v47 = vadd.f32 %v1015_v45, %v482_v46  ;;  %v125_v46 = vld [vmem:[#allocation4 + $0x290] sm:$0xff] }
 0x1bd   :  { %790 = vmatpush.msrb.mxu0 %v125_v46 }
 0x1be   :  { %v530_v48 = vmax.f32 %v483_v47, 0.0 }
 0x1c0   :  { %563 = vmatmul.f32.vlgmr.msrb.gmra.mxu1 %v530_v48 }
 0x1c3   :  { %v485_v49 = vpop.f32.mrf.mxu3 }
 0x1c4   :  { %v486_v50 = vadd.f32 %v1015_v45, %v485_v49  ;;  %v124_v49 = vld [vmem:[#allocation4 + $0x288] sm:$0xff] }
 0x1c5   :  { %791 = vmatpush.msrb.mxu0 %v124_v49 }
 0x1c6   :  { %v531_v51 = vmax.f32 %v486_v50, 0.0 }
 0x1c8   :  { %566 = vmatmul.f32.gmra.mxu1 %v531_v51 }
 0x1cb   :  { %v488_v52 = vpop.f32.mrf.mxu3 }
 0x1cc   :  { %v489_v10 = vadd.f32 %v1015_v45, %v488_v52 }
 0x1ce   :  { %v532_v53 = vmax.f32 %v489_v10, 0.0  ;;  %v123_v10 = vld [vmem:[#allocation4 + $0x280] sm:$0xff] }
 0x1cf   :  { %792 = vmatpush.msrb.mxu0 %v123_v10 }
 0x1d0   :  { %569 = vmatmul.f32.gmra.mxu1 %v532_v53 }
 0x1d3   :  { %v491_v43 = vpop.f32.mrf.mxu3 }
 0x1d4   :  { %v492_v54 = vadd.f32 %v1015_v45, %v491_v43 }
 0x1d6   :  { %v533_v55 = vmax.f32 %v492_v54, 0.0  ;;  %v122_v54 = vld [vmem:[#allocation4 + $0x278] sm:$0xff] }
 0x1d7   :  { %793 = vmatpush.msrb.mxu0 %v122_v54 }
 0x1d8   :  { %572 = vmatmul.f32.gmra.mxu1 %v533_v55 }
 0x1db   :  { %v494_v56 = vpop.f32.mrf.mxu3 }
 0x1dc   :  { %v495_v57 = vadd.f32 %v1015_v45, %v494_v56 }
 0x1de   :  { %v534_v58 = vmax.f32 %v495_v57, 0.0 }
 0x1e0   :  { %575 = vmatmul.f32.gmra.mxu1 %v534_v58 }
 0x1e3   :  { %v497_v59 = vpop.f32.mrf.mxu3 }
 0x1e4   :  { %v498_v60 = vadd.f32 %v1015_v45, %v497_v59  ;;  %v121_v59 = vld [vmem:[#allocation4 + $0x270] sm:$0xff] }
 0x1e5   :  { %794 = vmatpush.msrb.mxu0 %v121_v59 }
 0x1e6   :  { %v535_v61 = vmax.f32 %v498_v60, 0.0 }
 0x1e8   :  { %578 = vmatmul.f32.gmra.mxu1 %v535_v61 }
 0x1eb   :  { %v500_v62 = vpop.f32.mrf.mxu3 }
 0x1ec   :  { %v501_v63 = vadd.f32 %v1015_v45, %v500_v62 }
 0x1ee   :  { %v536_v0 = vmax.f32 %v501_v63, 0.0  ;;  %v120_v63 = vld [vmem:[#allocation4 + $0x268] sm:$0xff] }
 0x1ef   :  { %795 = vmatpush.msrb.mxu0 %v120_v63 }
 0x1f0   :  { %581 = vmatmul.f32.gmra.mxu1 %v536_v0 }
 0x1f3   :  { %v503_v1 = vpop.f32.mrf.mxu3 }
 0x1f4   :  { %v504_v2 = vadd.f32 %v1015_v45, %v503_v1 }
 0x1f6   :  { %v537_v3 = vmax.f32 %v504_v2, 0.0 }
 0x1f8   :  { %584 = vmatmul.f32.gmra.mxu1 %v537_v3 }
 0x1fb   :  { %v506_v4 = vpop.f32.mrf.mxu3 }
 0x1fc   :  { %v507_v5 = vadd.f32 %v1015_v45, %v506_v4 }
 0x1fe   :  { %v538_v6 = vmax.f32 %v507_v5, 0.0 }
 0x200   :  { %587 = vmatmul.f32.gmra.mxu1 %v538_v6 }
 0x203   :  { %v509_v7 = vpop.f32.mrf.mxu3 }
 0x204   :  { %v510_v8 = vadd.f32 %v1015_v45, %v509_v7 }
 0x206   :  { %v539_v9 = vmax.f32 %v510_v8, 0.0 }
 0x208   :  { %590 = vmatmul.f32.gmra.mxu1 %v539_v9 }
 0x20b   :  { %v512_v11 = vpop.f32.mrf.mxu3 }
 0x20c   :  { %v513_v12 = vadd.f32 %v1015_v45, %v512_v11 }
 0x20e   :  { %v540_v13 = vmax.f32 %v513_v12, 0.0 }
 0x210   :  { %593 = vmatmul.f32.gmra.mxu1 %v540_v13 }
 0x213   :  { %v515_v14 = vpop.f32.mrf.mxu3 }
 0x214   :  { %v516_v15 = vadd.f32 %v1015_v45, %v515_v14 }
 0x216   :  { %v541_v16 = vmax.f32 %v516_v15, 0.0 }
 0x218   :  { %596 = vmatmul.f32.gmra.mxu1 %v541_v16 }
 0x21b   :  { %v518_v17 = vpop.f32.mrf.mxu3 }
 0x21c   :  { %v519_v18 = vadd.f32 %v1015_v45, %v518_v17 }
 0x21e   :  { %v542_v19 = vmax.f32 %v519_v18, 0.0 }
 0x220   :  { %599 = vmatmul.f32.gmra.mxu1 %v542_v19 }
 0x223   :  { %v521_v20 = vpop.f32.mrf.mxu3 }
 0x224   :  { %v522_v21 = vadd.f32 %v1015_v45, %v521_v20 }
 0x226   :  { %v543_v22 = vmax.f32 %v522_v21, 0.0 }
 0x228   :  { %602 = vmatmul.f32.gmra.mxu1 %v543_v22 }
 0x22b   :  { %v524_v23 = vpop.f32.mrf.mxu3 }
 0x22c   :  { %v525_v24 = vadd.f32 %v1015_v45, %v524_v23 }
 0x22e   :  { %v544_v25 = vmax.f32 %v525_v24, 0.0 }
 0x230   :  { %605 = vmatmul.f32.gmra.mxu1 %v544_v25 }
 0x233   :  { %v527_v27 = vpop.f32.mrf.mxu3 }
 0x234   :  { %v528_v28 = vadd.f32 %v1015_v45, %v527_v27 }
 0x236   :  { %v545_v29 = vmax.f32 %v528_v28, 0.0 }
 0x238   :  { %608 = vmatmul.f32.gmra.mxu1 %v545_v29 }
 0x23d   :  { %v564_v31 = vpop.f32.mrf.mxu1 }
 0x23e   :  { %v565_v50 = vadd.f32 %v1033_v44, %v564_v31 }
 0x240   :  { %v612_v55 = vmax.f32 %v565_v50, 0.0 }
 0x242   :  { %v628_v0 = vrot.slane %v612_v55, 4 }
 0x244   :  { %v629_v7 = vadd.f32 %v628_v0, %v612_v55 }
 0x245   :  { %v567_v33 = vpop.f32.mrf.mxu1 }
 0x246   :  { %v568_v47 = vadd.f32 %v1033_v44, %v567_v33  ;;  %v630_v16 = vrot.slane %v629_v7, 2 }
 0x248   :  { %v613_v53 = vmax.f32 %v568_v47, 0.0  ;;  %v631_v24 = vadd.f32 %v630_v16, %v629_v7 }
 0x24a   :  { %v634_v60 = vrot.slane %v613_v53, 4  ;;  %v632_v34 = vrot.slane %v631_v24, 1 }
 0x24c   :  { %v635_v4 = vadd.f32 %v634_v60, %v613_v53  ;;  %v633_v46 = vadd.f32 %v632_v34, %v631_v24 }
 0x24d   :  { %v570_v35 = vpop.f32.mrf.mxu1 }
 0x24e   :  { %v571_v48 = vadd.f32 %v1033_v44, %v570_v35  ;;  %v636_v12 = vrot.slane %v635_v4, 2  ;;  %v724_v55 = vmul.f32 0.125, %v633_v46 }
 0x250   :  { %v614_v43 = vmax.f32 %v571_v48, 0.0  ;;  %v637_v20 = vadd.f32 %v636_v12, %v635_v4 }
 0x252   :  { %v640_v62 = vrot.slane %v614_v43, 4  ;;  %v638_v29 = vrot.slane %v637_v20, 1 }
 0x254   :  { %v641_v6 = vadd.f32 %v640_v62, %v614_v43  ;;  %v639_v39 = vadd.f32 %v638_v29, %v637_v20 }
 0x255   :  { %v573_v38 = vpop.f32.mrf.mxu1 }
 0x256   :  { %v574_v51 = vadd.f32 %v1033_v44, %v573_v38  ;;  %v642_v15 = vrot.slane %v641_v6, 2 }
 0x258   :  { %v615_v56 = vmax.f32 %v574_v51, 0.0  ;;  %v643_v23 = vadd.f32 %v642_v15, %v641_v6  ;;  %v725_v51 = vmul.f32 0.125, %v639_v39 }
 0x25a   :  { %v646_v1 = vrot.slane %v615_v56, 4  ;;  %v644_v33 = vrot.slane %v643_v23, 1  ;;  %v758_v60 = vsel %vm757_vm1, %v725_v51, %v724_v55 }
 0x25c   :  { %v647_v8 = vadd.f32 %v646_v1, %v615_v56  ;;  %v645_v42 = vadd.f32 %v644_v33, %v643_v23 }
 0x25d   :  { %v576_v45 = vpop.f32.mrf.mxu1 }
 0x25e   :  { %v577_v52 = vadd.f32 %v1033_v44, %v576_v45  ;;  %v648_v17 = vrot.slane %v647_v8, 2  ;;  %v726_v43 = vmul.f32 0.125, %v645_v42 }
 0x260   :  { %v616_v57 = vmax.f32 %v577_v52, 0.0  ;;  %v649_v25 = vadd.f32 %v648_v17, %v647_v8  ;;  %v760_v63 = vsel %vm759_vm2, %v726_v43, %v758_v60  ;;  %v151_v60 = vld [vmem:[#allocation4 + $0x360] sm:$0xff] }
 0x262   :  { %v652_v3 = vrot.slane %v616_v57, 4  ;;  %v650_v35 = vrot.slane %v649_v25, 1 }
 0x264   :  { %v653_v9 = vadd.f32 %v652_v3, %v616_v57  ;;  %v651_v47 = vadd.f32 %v650_v35, %v649_v25 }
 0x265   :  { %v579_v58 = vpop.f32.mrf.mxu1 }
 0x266   :  { %v580_v61 = vadd.f32 %v1033_v44, %v579_v58  ;;  %v654_v19 = vrot.slane %v653_v9, 2  ;;  %v727_v56 = vmul.f32 0.125, %v651_v47 }
 0x268   :  { %v617_v2 = vmax.f32 %v580_v61, 0.0  ;;  %v655_v27 = vadd.f32 %v654_v19, %v653_v9 }
 0x26a   :  { %v658_v5 = vrot.slane %v617_v2, 4  ;;  %v656_v38 = vrot.slane %v655_v27, 1 }
 0x26c   :  { %v659_v13 = vadd.f32 %v658_v5, %v617_v2  ;;  %v657_v49 = vadd.f32 %v656_v38, %v655_v27  ;;  %v762_v2 = vsel %vm761_vm3, %v727_v56, %v760_v63 }
 0x26d   :  { %v582_v11 = vpop.f32.mrf.mxu1 }
 0x26e   :  { %v583_v14 = vadd.f32 %v1033_v44, %v582_v11  ;;  %v660_v21 = vrot.slane %v659_v13, 2  ;;  %v728_v58 = vmul.f32 0.125, %v657_v49 }
 0x270   :  { %v618_v18 = vmax.f32 %v583_v14, 0.0  ;;  %v661_v30 = vadd.f32 %v660_v21, %v659_v13  ;;  %v764_v5 = vsel %vm763_vm4, %v728_v58, %v762_v2 }
 0x272   :  { %v664_v22 = vrot.slane %v618_v18, 4  ;;  %v662_v40 = vrot.slane %v661_v30, 1 }
 0x274   :  { %v665_v26 = vadd.f32 %v664_v22, %v618_v18  ;;  %v663_v52 = vadd.f32 %v662_v40, %v661_v30 }
 0x275   :  { %v585_v28 = vpop.f32.mrf.mxu1 }
 0x276   :  { %v666_v31 = vrot.slane %v665_v26, 2  ;;  %v586_v32 = vadd.f32 %v1033_v44, %v585_v28  ;;  %v729_v61 = vmul.f32 0.125, %v663_v52  ;;  %v152_v52 = vld [vmem:[#allocation4 + $0x368] sm:$0xff] }
 0x277   :  { %806 = vmatpush.msra.mxu2 %v152_v52 }
 0x278   :  { %v667_v36 = vadd.f32 %v666_v31, %v665_v26  ;;  %v619_v37 = vmax.f32 %v586_v32, 0.0  ;;  %v766_v8 = vsel %vm765_vm5, %v729_v61, %v764_v5  ;;  %v150_v61 = vld [vmem:[#allocation4 + $0x358] sm:$0xff] }
 0x279   :  { %807 = vmatpush.msra.mxu2 %v151_v60 }
 0x27a   :  { %v670_v41 = vrot.slane %v619_v37, 4  ;;  %v668_v45 = vrot.slane %v667_v36, 1 }
 0x27b   :  { %808 = vmatpush.msra.mxu2 %v150_v61 }
 0x27c   :  { %v671_v48 = vadd.f32 %v670_v41, %v619_v37  ;;  %v669_v54 = vadd.f32 %v668_v45, %v667_v36 }
 0x27d   :  { %v588_v50 = vpop.f32.mrf.mxu1 }
 0x27e   :  { %v672_v10 = vrot.slane %v671_v48, 2  ;;  %v589_v53 = vadd.f32 %v1033_v44, %v588_v50  ;;  %v730_v0 = vmul.f32 0.125, %v669_v54 }
 0x280   :  { %v673_v57 = vadd.f32 %v672_v10, %v671_v48  ;;  %v620_v59 = vmax.f32 %v589_v53, 0.0  ;;  %v768_v9 = vsel %vm767_vm6, %v730_v0, %v766_v8  ;;  %v149_v0 = vld [vmem:[#allocation4 + $0x350] sm:$0xff]  ;;  %v147_v8 = vld [vmem:[#allocation4 + $0x340] sm:$0xff] }
 0x281   :  { %809 = vmatpush.msra.mxu2 %v149_v0 }
 0x282   :  { %v674_v62 = vrot.slane %v673_v57, 1  ;;  %v676_v3 = vrot.slane %v620_v59, 4 }
 0x284   :  { %v675_v1 = vadd.f32 %v674_v62, %v673_v57  ;;  %v677_v13 = vadd.f32 %v676_v3, %v620_v59 }
 0x285   :  { %v591_v4 = vpop.f32.mrf.mxu1 }
 0x286   :  { %v592_v6 = vadd.f32 %v1033_v44, %v591_v4  ;;  %v731_v7 = vmul.f32 0.125, %v675_v1  ;;  %v678_v16 = vrot.slane %v677_v13, 2  ;;  %v148_v4 = vld [vmem:[#allocation4 + $0x348] sm:$0xff] }
 0x287   :  { %810 = vmatpush.msra.mxu2 %v148_v4 }
 0x288   :  { %v621_v11 = vmax.f32 %v592_v6, 0.0  ;;  %v770_v12 = vsel %vm769_vm7, %v731_v7, %v768_v9  ;;  %v679_v22 = vadd.f32 %v678_v16, %v677_v13  ;;  %v146_v13 = vld [vmem:[#allocation4 + $0x338] sm:$0xff]  ;;  %v145_v16 = vld [vmem:[#allocation4 + $0x330] sm:$0xff] }
 0x289   :  { %796 = vmatmul.f32.vlgmr.msrb.gmra.mxu0 %v770_v12  ;;  %811 = vmatpush.msra.mxu2 %v147_v8 }
 0x28a   :  { %v682_v14 = vrot.slane %v621_v11, 4  ;;  %v680_v26 = vrot.slane %v679_v22, 1 }
 0x28b   :  { %812 = vmatpush.msra.mxu2 %v146_v13 }
 0x28c   :  { %v683_v15 = vadd.f32 %v682_v14, %v621_v11  ;;  %v681_v33 = vadd.f32 %v680_v26, %v679_v22 }
 0x28d   :  { %v594_v17 = vpop.f32.mrf.mxu1  ;;  %813 = vmatpush.msra.mxu2 %v145_v16 }
 0x28e   :  { %v684_v18 = vrot.slane %v683_v15, 2  ;;  %v595_v19 = vadd.f32 %v1033_v44, %v594_v17  ;;  %v732_v39 = vmul.f32 0.125, %v681_v33 }
 0x290   :  { %v685_v20 = vadd.f32 %v684_v18, %v683_v15  ;;  %v622_v21 = vmax.f32 %v595_v19, 0.0 }
 0x292   :  { %v688_v23 = vrot.slane %v622_v21, 4  ;;  %v686_v24 = vrot.slane %v685_v20, 1 }
 0x294   :  { %v689_v25 = vadd.f32 %v688_v23, %v622_v21  ;;  %v687_v30 = vadd.f32 %v686_v24, %v685_v20  ;;  %v144_v20 = vld [vmem:[#allocation4 + $0x328] sm:$0xff]  ;;  %v143_v24 = vld [vmem:[#allocation4 + $0x320] sm:$0xff] }
 0x295   :  { %v597_v27 = vpop.f32.mrf.mxu1  ;;  %814 = vmatpush.msra.mxu2 %v144_v20 }
 0x296   :  { %v690_v28 = vrot.slane %v689_v25, 2  ;;  %v598_v29 = vadd.f32 %v1033_v44, %v597_v27  ;;  %v733_v36 = vmul.f32 0.125, %v687_v30 }
 0x297   :  { %815 = vmatpush.msra.mxu2 %v143_v24 }
 0x298   :  { %v691_v31 = vadd.f32 %v690_v28, %v689_v25  ;;  %v623_v32 = vmax.f32 %v598_v29, 0.0  ;;  %v771_v46 = vsel %vm757_vm1, %v733_v36, %v732_v39  ;;  %v142_v28 = vld [vmem:[#allocation4 + $0x318] sm:$0xff] }
 0x299   :  { %816 = vmatpush.msra.mxu2 %v142_v28 }
 0x29a   :  { %v692_v34 = vrot.slane %v691_v31, 1  ;;  %v694_v35 = vrot.slane %v623_v32, 4 }
 0x29c   :  { %v693_v37 = vadd.f32 %v692_v34, %v691_v31  ;;  %v695_v38 = vadd.f32 %v694_v35, %v623_v32  ;;  %v141_v31 = vld [vmem:[#allocation4 + $0x310] sm:$0xff]  ;;  %v140_v34 = vld [vmem:[#allocation4 + $0x308] sm:$0xff] }
 0x29d   :  { %v600_v40 = vpop.f32.mrf.mxu1  ;;  %817 = vmatpush.msra.mxu2 %v141_v31 }
 0x29e   :  { %v734_v41 = vmul.f32 0.125, %v693_v37  ;;  %v696_v42 = vrot.slane %v695_v38, 2  ;;  %v601_v45 = vadd.f32 %v1033_v44, %v600_v40 }
 0x29f   :  { %818 = vmatpush.msra.mxu2 %v140_v34 }
 0x2a0   :  { %v697_v47 = vadd.f32 %v696_v42, %v695_v38  ;;  %v624_v48 = vmax.f32 %v601_v45, 0.0  ;;  %v772_v49 = vsel %vm759_vm2, %v734_v41, %v771_v46  ;;  %v139_v42 = vld [vmem:[#allocation4 + $0x300] sm:$0xff]  ;;  %v138_v45 = vld [vmem:[#allocation4 + $0x2f8] sm:$0xff]  ;;  %v137_v46 = vld [vmem:[#allocation4 + $0x2f0] sm:$0xff] }
 0x2a1   :  { %819 = vmatpush.msra.mxu2 %v139_v42 }
 0x2a2   :  { %v698_v50 = vrot.slane %v697_v47, 1  ;;  %v700_v51 = vrot.slane %v624_v48, 4 }
 0x2a3   :  { %820 = vmatpush.msra.mxu2 %v138_v45 }
 0x2a4   :  { %v699_v10 = vadd.f32 %v698_v50, %v697_v47  ;;  %v701_v53 = vadd.f32 %v700_v51, %v624_v48  ;;  %v882_v47 = vld [vmem:[#allocation4 + $0x2e8] ss:$0 sm:$0xff] }
 0x2a5   :  { %v603_v43 = vpop.f32.mrf.mxu1  ;;  %821 = vmatpush.msra.mxu2 %v137_v46 }
 0x2a6   :  { %v735_v54 = vmul.f32 0.125, %v699_v10  ;;  %v702_v55 = vrot.slane %v701_v53, 2  ;;  %v604_v56 = vadd.f32 %v1033_v44, %v603_v43 }
 0x2a8   :  { %v703_v57 = vadd.f32 %v702_v55, %v701_v53  ;;  %v625_v58 = vmax.f32 %v604_v56, 0.0  ;;  %v773_v59 = vsel %vm761_vm3, %v735_v54, %v772_v49  ;;  %v883_v53 = vld [vmem:[#allocation4 + $0x370] ss:$0 sm:$0xff] }
 0x2aa   :  { %v704_v62 = vrot.slane %v703_v57, 1  ;;  %v706_v63 = vrot.slane %v625_v58, 4 }
 0x2ac   :  { %v705_v1 = vadd.f32 %v704_v62, %v703_v57  ;;  %v707_v2 = vadd.f32 %v706_v63, %v625_v58 }
 0x2ad   :  { %v606_v3 = vpop.f32.mrf.mxu1 }
 0x2ae   :  { %v736_v5 = vmul.f32 0.125, %v705_v1  ;;  %v708_v6 = vrot.slane %v707_v2, 2  ;;  %v607_v7 = vadd.f32 %v1033_v44, %v606_v3 }
 0x2b0   :  { %v709_v9 = vadd.f32 %v708_v6, %v707_v2  ;;  %v626_v11 = vmax.f32 %v607_v7, 0.0  ;;  %v774_v12 = vsel %vm763_vm4, %v736_v5, %v773_v59 }
 0x2b2   :  { %v710_v14 = vrot.slane %v709_v9, 1  ;;  %v712_v15 = vrot.slane %v626_v11, 4 }
 0x2b4   :  { %v711_v17 = vadd.f32 %v710_v14, %v709_v9  ;;  %v713_v18 = vadd.f32 %v712_v15, %v626_v11 }
 0x2b5   :  { %v609_v19 = vpop.f32.mrf.mxu1 }
 0x2b6   :  { %v737_v21 = vmul.f32 0.125, %v711_v17  ;;  %v714_v22 = vrot.slane %v713_v18, 2  ;;  %v610_v23 = vadd.f32 %v1033_v44, %v609_v19 }
 0x2b8   :  { %v715_v25 = vadd.f32 %v714_v22, %v713_v18  ;;  %v627_v26 = vmax.f32 %v610_v23, 0.0  ;;  %v775_v27 = vsel %vm765_vm5, %v737_v21, %v774_v12 }
 0x2ba   :  { %v716_v29 = vrot.slane %v715_v25, 1  ;;  %v718_v30 = vrot.slane %v627_v26, 4 }
 0x2bc   :  { %v717_v32 = vadd.f32 %v716_v29, %v715_v25  ;;  %v719_v33 = vadd.f32 %v718_v30, %v627_v26 }
 0x2be   :  { %v720_v35 = vrot.slane %v719_v33, 2  ;;  %v738_v36 = vmul.f32 0.125, %v717_v32 }
 0x2c0   :  { %v721_v44 = vadd.f32 %v720_v35, %v719_v33  ;;  %v776_v37 = vsel %vm767_vm6, %v738_v36, %v775_v27 }
 0x2c2   :  { %v722_v38 = vrot.slane %v721_v44, 1 }
 0x2c4   :  { %v723_v39 = vadd.f32 %v722_v38, %v721_v44 }
 0x2c6   :  { %v739_v40 = vmul.f32 0.125, %v723_v39 }
 0x2c8   :  { %v777_v41 = vsel %vm769_vm7, %v739_v40, %v776_v37 }
 0x2c9   :  { %799 = vmatmul.f32.gmra.mxu0 %v777_v41 }
 0x306   :  { %v797_v48 = vpop.f32.mrf.mxu0 }
 0x307   :  { %v798_v49 = vadd.f32 %v882_v47, %v797_v48 }
 0x309   :  { %v803_v50 = vmax.f32 %v798_v49, 0.0 }
 0x30b   :  { %822 = vmatmul.f32.vlgmr.msra.gmra.mxu2 %v803_v50 }
 0x346   :  { %v800_v51 = vpop.f32.mrf.mxu0 }
 0x347   :  { %v801_v52 = vadd.f32 %v882_v47, %v800_v51 }
 0x349   :  { %v804_v10 = vmax.f32 %v801_v52, 0.0 }
 0x34b   :  { %825 = vmatmul.f32.gmra.mxu2 %v804_v10 }
 0x38e   :  { %v823_v43 = vpop.f32.mrf.mxu2 }
 0x38f   :  { %v824_v54 = vadd.f32 %v883_v53, %v823_v43 }
 0x391   :  { %830 = vst.msk [vmem:[%s1073_s2] sm:$0xff] %vm829_vm8, %v824_v54 }
 0x3ce   :  { %v826_v55 = vpop.f32.mrf.mxu2 }
 0x3cf   :  { %v827_v56 = vadd.f32 %v883_v53, %v826_v55 }
 0x3d1   :  { %831 = vst.msk [vmem:[%s1073_s2 + $0x8] sm:$0xff] %vm829_vm8, %v827_v56 }
 0x3d2   :  { %836 = vsyncpa [#allocation3], 1 }
 0x3d3   :  { %837 = vsyncpa [#allocation5], 1 }

</bundles_post_ra>
